<compile_context>
chip_gen: v7x
topology: tpu7x:2x2x1
jax: 0.10.0
libtpu: 0.0.40
codegen_flags: <defaults>
</compile_context>

<pallas_src>
import functools

import jax
import jax.numpy as jnp
from jax.experimental import pallas as pl
from jax.experimental.pallas import tpu as pltpu

K = 3  # kernel_size == stride (PyTorch MaxPool2d default: stride = kernel_size)


def _maxpool_kernel(x_ref, o_ref, *, wp):
    """One row-block of the pooling.

    x_ref: (BR, 3*wp)   row r holds the K=3 input rows of one pooling band,
                        concatenated along the lane axis (free host reshape).
    o_ref: (BR, wp-2)   lane 3*wo of row r holds the pooled output (r, wo);
                        the other lanes hold shifted-window junk that the
                        caller drops with a stride-3 slice.
    """
    # H-reduction: elementwise max of the three lane bands (VPU work only).
    r0 = x_ref[:, 0:wp]
    r1 = x_ref[:, wp:2 * wp]
    r2 = x_ref[:, 2 * wp:3 * wp]
    h = jnp.maximum(jnp.maximum(r0, r1), r2)                  # (BR, wp)

    # W-reduction: max of three shifted views.  Lane j of the result is
    # max(h[:, j], h[:, j+1], h[:, j+2]); at j = 3*wo that is exactly the
    # 3x3 window maximum.
    o_ref[...] = jnp.maximum(jnp.maximum(h[:, 0:wp - 2], h[:, 1:wp - 1]),
                             h[:, 2:wp])


def maxpool2d_k3_ceil(x, *, max_block_rows=512, vmem_block_bytes=4 * 1024 * 1024):
    """MaxPool2d(kernel_size=3, ceil_mode=True) over an NCHW input."""
    N, C, H, W = x.shape
    # ceil_mode output size: ceil((H - K)/S) + 1   (padding=0, dilation=1)
    Ho = -(-(H - K) // K) + 1
    Wo = -(-(W - K) // K) + 1
    Hp, Wp = Ho * K, Wo * K

    # Pad the partial edge windows with the dtype's "minus infinity" so the
    # in-kernel maxima ignore them (every window holds >=1 valid element).
    if jnp.issubdtype(x.dtype, jnp.floating):
        neg = jnp.array(-jnp.inf, dtype=x.dtype)
    else:
        neg = jnp.array(jnp.iinfo(x.dtype).min, dtype=x.dtype)
    xp = x
    if Hp != H or Wp != W:
        xp = jnp.pad(x, ((0, 0), (0, 0), (0, Hp - H), (0, Wp - W)),
                     constant_values=neg)

    # Free row-major reshape: row r = (n, c, ho) contains input rows
    # [3*ho, 3*ho+1, 3*ho+2] of that image laid side by side along lanes.
    R = N * C * Ho
    xr = xp.reshape(R, K * Wp)

    # Row blocking: as many rows per block as the VMEM budget allows
    # (conservative for v7x's smaller VMEM); last block may be partial.
    row_bytes = K * Wp * x.dtype.itemsize
    cap = max(8, (vmem_block_bytes // max(row_bytes, 1)) // 8 * 8)
    if R <= cap:
        br = R                      # single (or full-height) block
    else:
        br = min(max_block_rows, cap)  # multiple of 8
    grid = (pl.cdiv(R, br),)

    out_sparse = pl.pallas_call(
        functools.partial(_maxpool_kernel, wp=Wp),
        out_shape=jax.ShapeDtypeStruct((R, Wp - 2), x.dtype),
        grid=grid,
        in_specs=[pl.BlockSpec((br, K * Wp), lambda i: (i, 0))],
        out_specs=pl.BlockSpec((br, Wp - 2), lambda i: (i, 0)),
        compiler_params=pltpu.CompilerParams(
            dimension_semantics=("parallel",)),
    )(xr)

    # Stride-3 lane decimation (layout only; operates on 1/3 of the input
    # size and writes the final 1/9-sized output), then back to NCHW.
    return out_sparse[:, ::K].reshape(N, C, Ho, Wo)


def _reference_maxpool(x):
    """Independent pure-JAX reference with the same ceil_mode semantics."""
    N, C, H, W = x.shape
    Ho = -(-(H - K) // K) + 1
    Wo = -(-(W - K) // K) + 1
    Hp, Wp = Ho * K, Wo * K
    if jnp.issubdtype(x.dtype, jnp.floating):
        init = jnp.array(-jnp.inf, dtype=x.dtype)
    else:
        init = jnp.array(jnp.iinfo(x.dtype).min, dtype=x.dtype)
    return jax.lax.reduce_window(
        x, init, jax.lax.max,
        window_dimensions=(1, 1, K, K),
        window_strides=(1, 1, K, K),
        padding=[(0, 0), (0, 0), (0, Hp - H), (0, Wp - W)])


if __name__ == "__main__":
    key = jax.random.PRNGKey(0)
    # Small NCHW input consistent with the module's forward.
    x = jax.random.normal(key, (2, 4, 16, 16), dtype=jnp.float32)

    pool = jax.jit(maxpool2d_k3_ceil)
    y = jax.block_until_ready(pool(x))

    y_ref = _reference_maxpool(x)
    assert y.shape == y_ref.shape == (2, 4, 6, 6), y.shape
    assert jnp.allclose(y, y_ref), "Pallas maxpool mismatch vs reference"

    print("KERNEL_OK")
</pallas_src>

<mosaic_0001>
module attributes {stable_mosaic.version = 11 : i64} {
  func.func @_maxpool_kernel(%arg0: i32, %arg1: memref<48x54xf32, #tpu.memory_space<vmem>>, %arg2: memref<48x16xf32, #tpu.memory_space<vmem>>) attributes {dimension_semantics = [#tpu.dimension_semantics<parallel>], iteration_bounds = array<i64: 1>, scalar_prefetch = 0 : i64, scratch_operands = 0 : i64, tpu.core_type = #tpu.core_type<tc>, window_params = [{transform_indices = @transform_0, window_bounds = array<i64: 48, 54>}, {transform_indices = @transform_1, window_bounds = array<i64: 48, 16>}]} {
    %c0 = arith.constant 0 : index
    %c0_0 = arith.constant 0 : index
    %0 = vector.load %arg1[%c0, %c0_0] : memref<48x54xf32, #tpu.memory_space<vmem>>, vector<48x18xf32>
    %c0_1 = arith.constant 0 : index
    %c18 = arith.constant 18 : index
    %1 = vector.load %arg1[%c0_1, %c18] : memref<48x54xf32, #tpu.memory_space<vmem>>, vector<48x18xf32>
    %c0_2 = arith.constant 0 : index
    %c36 = arith.constant 36 : index
    %2 = vector.load %arg1[%c0_2, %c36] : memref<48x54xf32, #tpu.memory_space<vmem>>, vector<48x18xf32>
    %3 = arith.maximumf %0, %1 : vector<48x18xf32>
    %4 = arith.maximumf %3, %2 : vector<48x18xf32>
    %5 = vector.extract_strided_slice %4 {offsets = [0, 0], sizes = [48, 16], strides = [1, 1]} : vector<48x18xf32> to vector<48x16xf32>
    %6 = vector.extract_strided_slice %4 {offsets = [0, 1], sizes = [48, 16], strides = [1, 1]} : vector<48x18xf32> to vector<48x16xf32>
    %7 = arith.maximumf %5, %6 : vector<48x16xf32>
    %8 = vector.extract_strided_slice %4 {offsets = [0, 2], sizes = [48, 16], strides = [1, 1]} : vector<48x18xf32> to vector<48x16xf32>
    %9 = arith.maximumf %7, %8 : vector<48x16xf32>
    %c0_3 = arith.constant 0 : index
    %c0_4 = arith.constant 0 : index
    %10 = vector.load %arg2[%c0_3, %c0_4] : memref<48x16xf32, #tpu.memory_space<vmem>>, vector<48x16xf32>
    tpu.vector_store %arg2[%c0_3, %c0_4], %9 {strides = array<i32>} : memref<48x16xf32, #tpu.memory_space<vmem>>, vector<48x16xf32>,
    return
  }
  func.func @transform_0(%arg0: i32) -> (i32, i32) {
    %c0_i32 = arith.constant 0 : i32
    %c0_i32_0 = arith.constant 0 : i32
    return %arg0, %c0_i32 : i32, i32
  }
  func.func @transform_1(%arg0: i32) -> (i32, i32) {
    %c0_i32 = arith.constant 0 : i32
    %c0_i32_0 = arith.constant 0 : i32
    return %arg0, %c0_i32 : i32, i32
  }
}

</mosaic_0001>

<bundles_post_ra>
// kernel: maxpool2d_k3_ceil.1
= control target key start
LH: loop header
LB: loop body
LE: loop exit
PB: predicated region body
PF: predicated region fallthrough
CT: control target
= control target key end

     0   :  { %s137_s10 = smov 110   ;;  %s138_s19 = smov 92   ;;  %vm122_vm0 = vcmask 130048   ;;  %s193_s0 = inlined_call_operand.vmem [shape: f32[48,54], index: 0, kind: input, shape index: {}]   ;;  %s194_s1 = inlined_call_operand.vmem [shape: f32[48,16], index: 1, kind: output, shape index: {}]  }
   0x1   :  { %v10_v0 = vld [vmem:[%s193_s0 + $0x10] sm:$0xff]  ;;  %v8_v1 = vld [vmem:[%s193_s0] sm:$0xff]  ;;  %v11_v2 = vld [vmem:[%s193_s0 + $0x18] sm:$0xff]  ;;  %s140_s20 = smov 126  }
   0x2   :  { %24 = vrot.lane.b32.xlu1 %v10_v0, %s137_s10  ;;  %20 = vrot.lane.b32.xlu0 %v8_v1, %s137_s10  ;;  %v9_v3 = vld [vmem:[%s193_s0 + $0x8] sm:$0xff]  ;;  %v12_v5 = vld [vmem:[%s193_s0 + $0x20] sm:$0xff] }
   0x3   :  { %v13_v4 = vld [vmem:[%s193_s0 + $0x28] sm:$0xff]  ;;  %s139_s0 = smov 127  }
   0x6   :  { %26 = vrot.lane.b32.xlu1 %v11_v2, %s137_s10  ;;  %22 = vrot.lane.b32.xlu0 %v9_v3, %s137_s10 }
   0xa   :  { %30 = vrot.lane.b32.xlu1 %v13_v4, %s137_s10  ;;  %28 = vrot.lane.b32.xlu0 %v12_v5, %s137_s10 }
   0xe   :  { %46 = vrot.lane.b32.xlu1 %v9_v3, %s138_s19  ;;  %44 = vrot.lane.b32.xlu0 %v8_v1, %s138_s19 }
  0x12   :  { %50 = vrot.lane.b32.xlu1 %v11_v2, %s138_s19  ;;  %48 = vrot.lane.b32.xlu0 %v10_v0, %s138_s19 }
  0x16   :  { %54 = vrot.lane.b32.xlu1 %v13_v4, %s138_s19  ;;  %52 = vrot.lane.b32.xlu0 %v12_v5, %s138_s19 }
  0x74   :  { %v25_v6 = vpop.permute.xlu1 %24  ;;  %v21_v7 = vpop.permute.xlu0 %20 }
  0x75   :  { %v38_v12 = vmax.f32 %v8_v1, %v21_v7  ;;  %v40_v18 = vmax.f32 %v10_v0, %v25_v6 }
  0x78   :  { %v27_v8 = vpop.permute.xlu1 %26  ;;  %v23_v9 = vpop.permute.xlu0 %22 }
  0x79   :  { %v39_v13 = vmax.f32 %v9_v3, %v23_v9  ;;  %v41_v19 = vmax.f32 %v11_v2, %v27_v8 }
  0x7c   :  { %v31_v10 = vpop.permute.xlu1 %30  ;;  %v29_v11 = vpop.permute.xlu0 %28 }
  0x7d   :  { %v43_v24 = vmax.f32 %v13_v4, %v31_v10  ;;  %v42_v25 = vmax.f32 %v12_v5, %v29_v11 }
  0x80   :  { %v47_v14 = vpop.permute.xlu1 %46  ;;  %v45_v15 = vpop.permute.xlu0 %44 }
  0x81   :  { %v63_v16 = vmax.f32 %v39_v13, %v47_v14  ;;  %v62_v17 = vmax.f32 %v38_v12, %v45_v15 }
  0x83   :  { %76 = vrot.lane.b32.xlu1 %v63_v16, %s139_s0  ;;  %74 = vrot.lane.b32.xlu0 %v62_v17, %s139_s0 }
  0x84   :  { %v51_v20 = vpop.permute.xlu1 %50  ;;  %v49_v21 = vpop.permute.xlu0 %48 }
  0x85   :  { %v65_v22 = vmax.f32 %v41_v19, %v51_v20  ;;  %v64_v23 = vmax.f32 %v40_v18, %v49_v21 }
  0x87   :  { %80 = vrot.lane.b32.xlu1 %v65_v22, %s139_s0  ;;  %78 = vrot.lane.b32.xlu0 %v64_v23, %s139_s0 }
  0x88   :  { %v55_v26 = vpop.permute.xlu1 %54  ;;  %v53_v27 = vpop.permute.xlu0 %52 }
  0x89   :  { %v67_v28 = vmax.f32 %v43_v24, %v55_v26  ;;  %v66_v29 = vmax.f32 %v42_v25, %v53_v27 }
  0x8b   :  { %84 = vrot.lane.b32.xlu1 %v67_v28, %s139_s0  ;;  %82 = vrot.lane.b32.xlu0 %v66_v29, %s139_s0 }
  0x8f   :  { %100 = vrot.lane.b32.xlu1 %v63_v16, %s140_s20  ;;  %98 = vrot.lane.b32.xlu0 %v62_v17, %s140_s20 }
  0x93   :  { %104 = vrot.lane.b32.xlu1 %v65_v22, %s140_s20  ;;  %102 = vrot.lane.b32.xlu0 %v64_v23, %s140_s20 }
  0x97   :  { %108 = vrot.lane.b32.xlu1 %v67_v28, %s140_s20  ;;  %106 = vrot.lane.b32.xlu0 %v66_v29, %s140_s20 }
  0xf5   :  { %v77_v30 = vpop.permute.xlu1 %76  ;;  %v75_v31 = vpop.permute.xlu0 %74 }
  0xf6   :  { %v93_v36 = vmax.f32 %v63_v16, %v77_v30  ;;  %v92_v37 = vmax.f32 %v62_v17, %v75_v31 }
  0xf9   :  { %v81_v32 = vpop.permute.xlu1 %80  ;;  %v79_v33 = vpop.permute.xlu0 %78 }
  0xfa   :  { %v95_v42 = vmax.f32 %v65_v22, %v81_v32  ;;  %v94_v43 = vmax.f32 %v64_v23, %v79_v33 }
  0xfd   :  { %v85_v34 = vpop.permute.xlu1 %84  ;;  %v83_v35 = vpop.permute.xlu0 %82 }
  0xfe   :  { %v97_v48 = vmax.f32 %v67_v28, %v85_v34  ;;  %v96_v49 = vmax.f32 %v66_v29, %v83_v35 }
 0x101   :  { %v101_v38 = vpop.permute.xlu1 %100  ;;  %v99_v39 = vpop.permute.xlu0 %98 }
 0x102   :  { %v117_v40 = vmax.f32 %v93_v36, %v101_v38  ;;  %v116_v41 = vmax.f32 %v92_v37, %v99_v39 }
 0x104   :  { %124 = vst.msk [vmem:[%s194_s1 + $0x8] sm:$0xff] %vm122_vm0, %v117_v40  ;;  %123 = vst.msk [vmem:[%s194_s1] sm:$0xff] %vm122_vm0, %v116_v41 }
 0x105   :  { %v105_v44 = vpop.permute.xlu1 %104  ;;  %v103_v45 = vpop.permute.xlu0 %102 }
 0x106   :  { %v119_v46 = vmax.f32 %v95_v42, %v105_v44  ;;  %v118_v47 = vmax.f32 %v94_v43, %v103_v45 }
 0x108   :  { %126 = vst.msk [vmem:[%s194_s1 + $0x18] sm:$0xff] %vm122_vm0, %v119_v46  ;;  %125 = vst.msk [vmem:[%s194_s1 + $0x10] sm:$0xff] %vm122_vm0, %v118_v47 }
 0x109   :  { %v109_v50 = vpop.permute.xlu1 %108  ;;  %v107_v51 = vpop.permute.xlu0 %106 }
 0x10a   :  { %v121_v52 = vmax.f32 %v97_v48, %v109_v50  ;;  %v120_v53 = vmax.f32 %v96_v49, %v107_v51 }
 0x10c   :  { %128 = vst.msk [vmem:[%s194_s1 + $0x28] sm:$0xff] %vm122_vm0, %v121_v52  ;;  %127 = vst.msk [vmem:[%s194_s1 + $0x20] sm:$0xff] %vm122_vm0, %v120_v53 }

</bundles_post_ra>
